<compile_context>
chip_gen: v7x
topology: tpu7x:2x2x1
jax: 0.10.0
libtpu: 0.0.40
codegen_flags: <defaults>
</compile_context>

<pallas_src>
import functools
import math

import jax
import jax.numpy as jnp
from jax import lax
from jax.experimental import pallas as pl
from jax.experimental.pallas import tpu as pltpu


_EPS = 1e-8
_VMEM_BUDGET = 20 * 1024 * 1024      # tile budget; scoped limit set to 32 MiB


def _round_up(x, m):
    return (x + m - 1) // m * m


def _tile_vmem_bytes(tm, tn, d_pad):
    bf16 = 2
    col = 2 * tn * d_pad * bf16       # double-buffered column block
    row = 2 * tm * d_pad * bf16       # double-buffered row block
    tmp = 3 * tm * tn * 4             # Gram tile / exp / mask intermediates (f32)
    out = 3 * tm * 4                  # output block + accumulator scratch
    return col + row + tmp + out


def _pick_tiles(s, d_pad, budget=_VMEM_BUDGET):
    """Pick (TM, TN, S_pad) for a stacked row count `s` and padded feature dim."""
    tms = [t for t in (512, 256, 128, 64, 32, 16, 8) if t <= _round_up(s, 8)]
    if not tms:
        tms = [8]
    # Regime A: whole stacked X resident as one column block (fetched once).
    for tm in tms:
        s_pad = _round_up(s, tm)
        if _tile_vmem_bytes(tm, s_pad, d_pad) <= budget:
            return tm, s_pad, s_pad
    # Regime B: stream column tiles; maximize TM first (it is the reuse knob).
    for tn in (256, 128, 64, 32, 16, 8):
        for tm in tms:
            if _tile_vmem_bytes(tm, tn, d_pad) <= budget:
                # tm, tn are powers-of-two multiples of 8 -> max is the lcm.
                return tm, tn, _round_up(s, max(tm, tn))
    return 8, 8, _round_up(s, 8)


def _denominator_kernel(xr_ref, xc_ref, out_ref, acc_ref, *, inv_tau, tm, tn,
                        n_valid):
    """Grid = (row_tiles, col_tiles); columns stream into a per-row accumulator.

    Inputs are already row-L2-normalized (hoisted to the wrapper) and bf16.
    Output per stacked row r:  log( sum_{c != r, c < n_valid} exp((G[r,c]-1)/tau) ).
    """
    i = pl.program_id(0)
    j = pl.program_id(1)

    @pl.when(j == 0)
    def _init():
        acc_ref[...] = jnp.zeros_like(acc_ref)

    # Single fused Gram tile on the MXU: contract the feature dims directly.
    s = lax.dot_general(xr_ref[...], xc_ref[...], (((1,), (1,)), ((), ())),
                        preferred_element_type=jnp.float32)        # (TM, TN)
    # cos <= 1  =>  (s - 1) * inv_tau <= ~0  =>  exp never overflows.
    e = jnp.exp((s - 1.0) * inv_tau)

    # Exact removal of the self-similarity term and of zero-padded columns via
    # an on-the-fly index mask (rides the idle VPU slots under the EUP exp).
    row_g = i * tm + lax.broadcasted_iota(jnp.int32, (tm, tn), 0)
    col_g = j * tn + lax.broadcasted_iota(jnp.int32, (tm, tn), 1)
    keep = (row_g != col_g) & (col_g < n_valid)
    e = jnp.where(keep, e, 0.0)

    # TODO(synk): for small D_pad, consider routing this row reduction through
    # the idle MXU (e @ ones) after confirming the XLU is the binding slot.
    acc_ref[...] += jnp.sum(e, axis=-1, keepdims=True)

    @pl.when(j == pl.num_programs(1) - 1)
    def _finalize():
        # log(true denominator) = inv_tau + log(acc); the constant inv_tau is
        # added back in the wrapper.  Padded rows give finite garbage (zero
        # rows -> acc = n_valid * exp(-inv_tau) > 0) and are sliced away.
        out_ref[...] = jnp.log(acc_ref[...])


def self_supervised_contrastive_loss(f, f_pos, temperature=1.0,
                                     reduction="mean"):
    B, D = f.shape
    inv_tau = 1.0 / float(temperature)

    # ---- hoisted preprocessing (one fused XLA pass, full f32) --------------
    x = jnp.concatenate([f, f_pos], axis=0).astype(jnp.float32)     # (2B, D)
    sumsq = jnp.sum(x * x, axis=-1, keepdims=True)
    xn = x * lax.rsqrt(jnp.maximum(sumsq, jnp.float32(_EPS * _EPS)))
    # Positive-pair cosines in exact f32 (removes the pair input / DMA).
    pos = jnp.sum(xn[:B] * xn[B:], axis=-1)                          # (B,)

    # ---- tiling -------------------------------------------------------------
    S = 2 * B
    D_pad = _round_up(D, 128)
    TM, TN, S_pad = _pick_tiles(S, D_pad)
    n_row_tiles = S_pad // TM
    n_col_tiles = S_pad // TN

    # bf16 streaming: halves HBM traffic and tile VMEM; matmul accumulates f32.
    x_pad = jnp.pad(xn, ((0, S_pad - S), (0, D_pad - D))).astype(jnp.bfloat16)

    kernel = functools.partial(_denominator_kernel, inv_tau=inv_tau,
                               tm=TM, tn=TN, n_valid=S)

    log_d = pl.pallas_call(
        kernel,
        out_shape=jax.ShapeDtypeStruct((S_pad, 1), jnp.float32),
        grid_spec=pltpu.PrefetchScalarGridSpec(
            num_scalar_prefetch=0,
            grid=(n_row_tiles, n_col_tiles),
            in_specs=[
                # row tile of the stacked, normalized features
                pl.BlockSpec((TM, D_pad), lambda i, j: (i, 0)),
                # streamed column block (whole X resident when n_col_tiles==1)
                pl.BlockSpec((TN, D_pad), lambda i, j: (j, 0)),
            ],
            out_specs=pl.BlockSpec((TM, 1), lambda i, j: (i, 0)),
            scratch_shapes=[
                pltpu.VMEM((TM, 1), jnp.float32),    # denominator accumulator
            ],
        ),
        compiler_params=pltpu.CompilerParams(
            dimension_semantics=("parallel", "arbitrary"),
            vmem_limit_bytes=32 * 1024 * 1024),
    )(x_pad, x_pad)

    log_d = log_d[:S, 0]
    # per-sample: loss_i = inv_tau + 0.5*(log_d_i + log_d_{B+i}) - pos_i/tau
    per_sample = inv_tau + 0.5 * (log_d[:B] + log_d[B:]) - pos * inv_tau
    total = jnp.sum(per_sample)

    if reduction == "mean":
        return total / B
    elif reduction == "sum":
        return total
    else:
        raise ValueError("Invalid reduction: {}".format(reduction))


def _reference(f, f_pos, temperature=1.0):
    # Pure-JAX reference following the PyTorch loop exactly.
    eps = 1e-8

    def cos(a, b):
        na = jnp.maximum(jnp.linalg.norm(a, axis=-1), eps)
        nb = jnp.maximum(jnp.linalg.norm(b, axis=-1), eps)
        return jnp.sum(a * b, axis=-1) / (na * nb)

    def delete_one_row(x, i):
        return jnp.concatenate([x[:i], x[i + 1:]], axis=0)

    B = f.shape[0]
    total = 0.0
    for i in range(B):
        m1 = f[i][None, :]
        m2 = f_pos[i][None, :]
        e1 = delete_one_row(f, i)
        e2 = delete_one_row(f_pos, i)
        s_mm = cos(m1, m2)
        a1 = jnp.exp(s_mm / temperature) / (
            jnp.exp(s_mm / temperature)
            + jnp.sum(jnp.exp(cos(m1, e1) / temperature))
            + jnp.sum(jnp.exp(cos(m1, e2) / temperature)))
        a2 = jnp.exp(s_mm / temperature) / (
            jnp.exp(s_mm / temperature)
            + jnp.sum(jnp.exp(cos(m2, e1) / temperature))
            + jnp.sum(jnp.exp(cos(m2, e2) / temperature)))
        total = total + 0.5 * (-jnp.log(a1) - jnp.log(a2))
    return (total / B)[0]


if __name__ == "__main__":
    key = jax.random.PRNGKey(0)
    k1, k2 = jax.random.split(key, 2)
    B, D = 8, 32
    f = jax.random.normal(k1, (B, D), dtype=jnp.float32)
    f_pos = jax.random.normal(k2, (B, D), dtype=jnp.float32)

    loss = jax.jit(self_supervised_contrastive_loss)(f, f_pos)
    jax.block_until_ready(loss)

    ref = _reference(f, f_pos)
    # Tolerance reflects bf16 matmul operands (the reference is full f32).
    assert jnp.allclose(loss, ref, atol=1e-3, rtol=1e-3), (float(loss), float(ref))

    print("KERNEL_OK")
</pallas_src>

<mosaic_0001>
module attributes {stable_mosaic.version = 11 : i64} {
  func.func @_denominator_kernel(%arg0: i32, %arg1: i32, %arg2: memref<16x128xbf16, #tpu.memory_space<vmem>>, %arg3: memref<16x128xbf16, #tpu.memory_space<vmem>>, %arg4: memref<16x1xf32, #tpu.memory_space<vmem>>, %arg5: memref<16x1xf32, #tpu.memory_space<vmem>>) attributes {dimension_semantics = [#tpu.dimension_semantics<parallel>, #tpu.dimension_semantics<arbitrary>], iteration_bounds = array<i64: 1, 1>, scalar_prefetch = 0 : i64, scratch_operands = 1 : i64, tpu.core_type = #tpu.core_type<tc>, window_params = [{transform_indices = @transform_0, window_bounds = array<i64: 16, 128>}, {transform_indices = @transform_1, window_bounds = array<i64: 16, 128>}, {transform_indices = @transform_2, window_bounds = array<i64: 16, 1>}]} {
    %c0_i32 = arith.constant 0 : i32
    %0 = arith.cmpi eq, %arg1, %c0_i32 : i32
    %1 = arith.extui %0 : i1 to i32
    %c0_i32_0 = arith.constant 0 : i32
    %2 = arith.cmpi ne, %1, %c0_i32_0 : i32
    scf.if %2 {
      %cst_16 = arith.constant 0.000000e+00 : f32
      %33 = vector.broadcast %cst_16 : f32 to vector<16x1xf32>
      %c0_17 = arith.constant 0 : index
      %c0_18 = arith.constant 0 : index
      %34 = vector.load %arg5[%c0_17, %c0_18] : memref<16x1xf32, #tpu.memory_space<vmem>>, vector<16x1xf32>
      tpu.vector_store %arg5[%c0_17, %c0_18], %33 {strides = array<i32>} : memref<16x1xf32, #tpu.memory_space<vmem>>, vector<16x1xf32>,
    } else {
    }
    %c0 = arith.constant 0 : index
    %c0_1 = arith.constant 0 : index
    %3 = vector.load %arg2[%c0, %c0_1] : memref<16x128xbf16, #tpu.memory_space<vmem>>, vector<16x128xbf16>
    %c0_2 = arith.constant 0 : index
    %c0_3 = arith.constant 0 : index
    %4 = vector.load %arg3[%c0_2, %c0_3] : memref<16x128xbf16, #tpu.memory_space<vmem>>, vector<16x128xbf16>
    %cst = arith.constant dense<0.000000e+00> : vector<16x16xf32>
    %5 = tpu.matmul %3, %4, %cst {dimension_numbers = #tpu.dot_dimension_numbers<[1], [1], [0], [0], [0, 0, 1, 0], [], []>} : vector<16x128xbf16>, vector<16x128xbf16>, vector<16x16xf32> -> vector<16x16xf32>
    %cst_4 = arith.constant 1.000000e+00 : f32
    %6 = vector.broadcast %cst_4 : f32 to vector<16x16xf32>
    %7 = arith.subf %5, %6 : vector<16x16xf32>
    %cst_5 = arith.constant 1.000000e+00 : f32
    %8 = vector.broadcast %cst_5 : f32 to vector<16x16xf32>
    %9 = arith.mulf %7, %8 : vector<16x16xf32>
    %10 = math.exp %9 : vector<16x16xf32>
    %c16_i32 = arith.constant 16 : i32
    %11 = arith.muli %arg0, %c16_i32 : i32
    %12 = tpu.iota {dimensions = array<i32: 0>} : vector<16x16xi32>
    %13 = vector.broadcast %11 : i32 to vector<16x16xi32>
    %14 = arith.addi %13, %12 : vector<16x16xi32>
    %c16_i32_6 = arith.constant 16 : i32
    %15 = arith.muli %arg1, %c16_i32_6 : i32
    %16 = tpu.iota {dimensions = array<i32: 1>} : vector<16x16xi32>
    %17 = vector.broadcast %15 : i32 to vector<16x16xi32>
    %18 = arith.addi %17, %16 : vector<16x16xi32>
    %19 = arith.cmpi ne, %14, %18 : vector<16x16xi32>
    %c16_i32_7 = arith.constant 16 : i32
    %20 = vector.broadcast %c16_i32_7 : i32 to vector<16x16xi32>
    %21 = arith.cmpi slt, %18, %20 : vector<16x16xi32>
    %22 = arith.andi %19, %21 : vector<16x16xi1>
    %cst_8 = arith.constant 0.000000e+00 : f32
    %23 = vector.broadcast %cst_8 : f32 to vector<16x16xf32>
    %24 = arith.select %22, %10, %23 : vector<16x16xi1>, vector<16x16xf32>
    %c0_9 = arith.constant 0 : index
    %c0_10 = arith.constant 0 : index
    %25 = vector.load %arg5[%c0_9, %c0_10] : memref<16x1xf32, #tpu.memory_space<vmem>>, vector<16x1xf32>
    %cst_11 = arith.constant dense<0.000000e+00> : vector<16xf32>
    %26 = vector.multi_reduction <add>, %24, %cst_11 [1] : vector<16x16xf32> to vector<16xf32>
    %27 = vector.shape_cast %26 : vector<16xf32> to vector<16x1xf32>
    %28 = arith.addf %25, %27 : vector<16x1xf32>
    %c0_12 = arith.constant 0 : index
    %c0_13 = arith.constant 0 : index
    %29 = vector.load %arg5[%c0_12, %c0_13] : memref<16x1xf32, #tpu.memory_space<vmem>>, vector<16x1xf32>
    tpu.vector_store %arg5[%c0_12, %c0_13], %28 {strides = array<i32>} : memref<16x1xf32, #tpu.memory_space<vmem>>, vector<16x1xf32>,
    %c0_i32_14 = arith.constant 0 : i32
    %30 = arith.cmpi eq, %arg1, %c0_i32_14 : i32
    %31 = arith.extui %30 : i1 to i32
    %c0_i32_15 = arith.constant 0 : i32
    %32 = arith.cmpi ne, %31, %c0_i32_15 : i32
    scf.if %32 {
      %c0_16 = arith.constant 0 : index
      %c0_17 = arith.constant 0 : index
      %33 = vector.load %arg5[%c0_16, %c0_17] : memref<16x1xf32, #tpu.memory_space<vmem>>, vector<16x1xf32>
      %34 = math.log %33 : vector<16x1xf32>
      %c0_18 = arith.constant 0 : index
      %c0_19 = arith.constant 0 : index
      %35 = vector.load %arg4[%c0_18, %c0_19] : memref<16x1xf32, #tpu.memory_space<vmem>>, vector<16x1xf32>
      tpu.vector_store %arg4[%c0_18, %c0_19], %34 {strides = array<i32>} : memref<16x1xf32, #tpu.memory_space<vmem>>, vector<16x1xf32>,
    } else {
    }
    return
  }
  func.func @transform_0(%arg0: i32, %arg1: i32) -> (i32, i32) {
    %c0_i32 = arith.constant 0 : i32
    %c0_i32_0 = arith.constant 0 : i32
    return %arg0, %c0_i32 : i32, i32
  }
  func.func @transform_1(%arg0: i32, %arg1: i32) -> (i32, i32) {
    %c0_i32 = arith.constant 0 : i32
    %c0_i32_0 = arith.constant 0 : i32
    return %arg1, %c0_i32 : i32, i32
  }
  func.func @transform_2(%arg0: i32, %arg1: i32) -> (i32, i32) {
    %c0_i32 = arith.constant 0 : i32
    %c0_i32_0 = arith.constant 0 : i32
    return %arg0, %c0_i32 : i32, i32
  }
}

</mosaic_0001>

<bundles_post_ra>
// kernel: self_supervised_contrastive_loss.1
= control target key start
LH: loop header
LB: loop body
LE: loop exit
PB: predicated region body
PF: predicated region fallthrough
CT: control target
= control target key end

     0   :  { %vm16_vm0 = vcmask 7168   ;;  %v154_v0 = vmov 0.0   ;;  %vm155_vm1 = vmmov 0   ;;  %v83_v4 = vlaneseq  ;;  %s189_s1 = inlined_call_operand.vmem [shape: bf16[16,128], index: 1, kind: input, shape index: {}, may-alias: {0,1}]   ;;  %s190_s0 = inlined_call_operand.vmem [shape: bf16[16,128], index: 0, kind: input, shape index: {}, may-alias: {0,1}]   ;;  %s191_s2 = inlined_call_operand.vmem [shape: f32[16,1], index: 2, kind: output, shape index: {}]  }
   0x1   :  { %17 = vst.msk [vmem:[#allocation2] sm:$0xff] %vm16_vm0, %v154_v0  ;;  %18 = vst.msk [vmem:[#allocation2 + $0x8] sm:$0xff] %vm16_vm0, %v154_v0  ;;  %136 = vmatprep.subr.bf16.mxu0 %v154_v0  ;;  %v144_v1 = vld [vmem:[%s189_s1] sm:$0xff]   ;;  %138 = vmatprep.mubr.msk.bf16.mxu0 %vm155_vm1, %v154_v0  ;;  %vm103_vm6 = vcmask 130048  }
   0x2   :  { %137 = vmatpush3.bf16.xpose.msra.mxu0 %v144_v1  ;;  %v145_v2 = vld [vmem:[%s190_s0] sm:$0xff]   ;;  %v84_v11 = vshrl.u32 %v83_v4, 7  ;;  %v91_v13 = vand.u32 127, %v83_v4 }
   0x4   :  { %v85_v14 = vadd.s32 8, %v84_v11  ;;  %vm94_vm2 = vcmp.ne.s32.totalorder %v84_v11, %v91_v13  ;;  %vm96_vm3 = vcmp.lt.s32.totalorder %v91_v13, 16 }
   0x5   :  { %vm97_vm5 = vmand %vm94_vm2, %vm96_vm3 }
   0x6   :  { %vm95_vm4 = vcmp.ne.s32.totalorder %v85_v14, %v91_v13 }
   0x7   :  { %vm98_vm7 = vmand %vm95_vm4, %vm96_vm3 }
   0x8   :  { %v101_v21 = vld [vmem:[#allocation2] sm:$0xff]  ;;  %v102_v24 = vld [vmem:[#allocation2 + $0x8] sm:$0xff] }
   0x9   :  { %139 = vmatmul.mubr.bf16.vlgmr.msra.gmra.mrb[0].mxu0 %v145_v2 }
  0xdc   :  { %v69_v3 = vpop.f32.mrb[0].mxu0 }
  0xdd   :  { %v132_v5 = vadd.f32 -1.0, %v69_v3  ;;  %v140_v6 = vpop.f32.mrb[1].mxu0 }
  0xde   :  { %v72_v7 = vpop.f32.mrb[2].mxu0 }
  0xdf   :  { %v78_v8 = vmul.f32 1.442695, %v132_v5  ;;  %v133_v9 = vadd.f32 -1.0, %v72_v7  ;;  %v141_v10 = vpop.f32.mrb[3].mxu0 }
  0xe1   :  { %146 = vpow2.f32 %v78_v8  ;;  %v80_v12 = vmul.f32 1.442695, %v133_v9 }
  0xe3   :  { %148 = vpow2.f32 %v80_v12 }
  0xeb   :  { %v147_v15 = vpop.eup %146 }
  0xec   :  { %v99_v16 = vsel %vm97_vm5, %v147_v15, 0.0 }
  0xed   :  { %v149_v17 = vpop.eup %148  ;;  %v104_v18 = vsel %vm103_vm6, %v99_v16, 0.0 }
  0xee   :  { %105 = vadd.xlane.f32.xlu0 %v104_v18  ;;  %v100_v19 = vsel %vm98_vm7, %v149_v17, 0.0 }
  0xef   :  { %v107_v20 = vsel %vm103_vm6, %v100_v19, 0.0 }
  0xf2   :  { %108 = vadd.xlane.f32.xlu0 %v107_v20 }
 0x17b   :  { %v106_v22 = vpop.xlane.xlu0 %105 }
 0x17c   :  { %v110_v23 = vadd.f32 %v106_v22, %v101_v21 }
 0x17e   :  { %113 = vst.msk [vmem:[#allocation2] sm:$0xff] %vm16_vm0, %v110_v23 }
 0x17f   :  { %v109_v25 = vpop.xlane.xlu0 %108 }
 0x180   :  { %v111_v26 = vadd.f32 %v109_v25, %v102_v24 }
 0x182   :  { %114 = vst.msk [vmem:[#allocation2 + $0x8] sm:$0xff] %vm16_vm0, %v111_v26 }
 0x185   :  { %v118_v27 = vld [vmem:[#allocation2] sm:$0xff] }
 0x186   :  { %150 = vlog2.f32 %v118_v27 }
 0x189   :  { %v119_v28 = vld [vmem:[#allocation2 + $0x8] sm:$0xff] }
 0x18a   :  { %152 = vlog2.f32 %v119_v28 }
 0x190   :  { %v151_v29 = vpop.eup %150 }
 0x191   :  { %v121_v30 = vmul.f32 0.6931472, %v151_v29 }
 0x193   :  { %124 = vst.msk [vmem:[%s191_s2] sm:$0xff] %vm16_vm0, %v121_v30 }
 0x194   :  { %v153_v31 = vpop.eup %152 }
 0x195   :  { %v123_v32 = vmul.f32 0.6931472, %v153_v31 }
 0x197   :  { %125 = vst.msk [vmem:[%s191_s2 + $0x8] sm:$0xff] %vm16_vm0, %v123_v32 }

</bundles_post_ra>
